<compile_context>
chip_gen: v6e
topology: v6e:2x2x1
jax: 0.10.0
libtpu: 0.0.40
codegen_flags: <defaults>
</compile_context>

<pallas_src>
import functools

import jax
import jax.numpy as jnp
from jax import lax
from jax.experimental import pallas as pl
from jax.experimental.pallas import tpu as pltpu

_LANE_CHUNK = 512  # rows per inner step; bounds f32 intermediates to ~16 vregs


def _autoencoder_kernel(x_ref,
                        w1_ref, b1_ref,
                        w2_ref, b2_ref,
                        w3_ref, b3_ref,
                        w4_ref, b4_ref,
                        out_ref):
    """x_ref / out_ref: (TB, D) natural-layout batch tile.
    Weights are PyTorch-style (out, in); biases are (out, 1) f32.
    Compute is lane-dense: batch lives on the 128-lane axis after an
    in-VMEM transpose, so all matmul/VPU work runs at full lane width."""
    # Tiny weights: read once per grid step (VMEM-resident across steps).
    w1, b1 = w1_ref[...], b1_ref[...]
    w2, b2 = w2_ref[...], b2_ref[...]
    w3, b3 = w3_ref[...], b3_ref[...]
    w4, b4 = w4_ref[...], b4_ref[...]

    def run_chunk(row0, rows):
        x = x_ref[pl.ds(row0, rows), :]                         # (rows, D)
        xt = x.T                                                # (D, rows): batch on lanes
        # encoder: Linear(D,32) -> ReLU -> Linear(32,16) -> ReLU
        h = jnp.dot(w1, xt, preferred_element_type=jnp.float32) + b1
        h = jnp.maximum(h, 0.0)
        h = jnp.dot(w2, h, preferred_element_type=jnp.float32) + b2
        h = jnp.maximum(h, 0.0)
        # decoder: Linear(16,32) -> ReLU -> Linear(32,D)
        h = jnp.dot(w3, h, preferred_element_type=jnp.float32) + b3
        h = jnp.maximum(h, 0.0)
        y = jnp.dot(w4, h, preferred_element_type=jnp.float32) + b4   # (D, rows)
        out_ref[pl.ds(row0, rows), :] = y.T.astype(out_ref.dtype)     # (rows, D)

    tb = x_ref.shape[0]  # static block size
    if tb % _LANE_CHUNK == 0 and tb > _LANE_CHUNK:
        n_chunks = tb // _LANE_CHUNK

        def body(c, carry):
            run_chunk(pl.multiple_of(c * _LANE_CHUNK, 128), _LANE_CHUNK)
            return carry

        lax.fori_loop(0, n_chunks, body, 0, unroll=True)
    else:
        run_chunk(0, tb)


def init_params(key, input_dim, dtype=jnp.float32):
    """PyTorch nn.Linear-style init U(-1/sqrt(fan_in), 1/sqrt(fan_in)).
    Weights stored (out, in) exactly like nn.Linear; biases (out,)."""
    dims = [(input_dim, 32), (32, 16), (16, 32), (32, input_dim)]
    params = []
    for fan_in, fan_out in dims:
        key, kw, kb = jax.random.split(key, 3)
        bound = 1.0 / float(fan_in) ** 0.5
        w = jax.random.uniform(kw, (fan_out, fan_in), dtype, -bound, bound)
        b = jax.random.uniform(kb, (fan_out,), dtype, -bound, bound)
        params.append((w, b))
    return params


def _round_up(n, m):
    return ((n + m - 1) // m) * m


def _round_down(n, m):
    return (n // m) * m


@functools.partial(jax.jit, static_argnames=("max_tb",))
def fraud_autoencoder(x, params, *, max_tb=8192):
    """x: (B, D) float32 or bfloat16. Returns the (B, D) reconstruction in x.dtype."""
    B, D = x.shape

    # ---- batch tile selection (all static; B is a trace-time constant) ----
    if B < 256:
        tb = B  # one full-array block (block dim == array dim is always legal)
    else:
        # Multiple of 128 (lane/sublane friendly), capped so the grid has at
        # least 2 steps -> both TensorCores used on v7x; harmless on v5e/v6e.
        tb = min(_round_up(max_tb, 128), max(128, _round_down(B // 2, 128)))
    grid_b = pl.cdiv(B, tb)  # ragged last block handled by Pallas (no wrapper pad)

    # Weights (out, in) as given; biases reshaped to (out, 1) and kept in f32
    # (f32 epilogue on the VPU; negligible bytes).
    flat = []
    for w, b in params:
        flat.append(w)
        flat.append(b.reshape(-1, 1).astype(jnp.float32))

    x_spec = pl.BlockSpec((tb, D), lambda i: (i, 0))
    # Full-array blocks + constant index map -> DMA'd once, VMEM-resident.
    param_specs = [pl.BlockSpec(p.shape, lambda i: (0, 0)) for p in flat]

    bytes_x = jnp.dtype(x.dtype).itemsize
    cost = pl.CostEstimate(
        flops=2 * B * (D * 32 + 32 * 16 + 16 * 32 + 32 * D),
        transcendentals=0,
        bytes_accessed=2 * B * D * bytes_x
        + sum(int(p.size) * p.dtype.itemsize for p in flat),
    )

    return pl.pallas_call(
        _autoencoder_kernel,
        out_shape=jax.ShapeDtypeStruct((B, D), x.dtype),
        grid_spec=pltpu.PrefetchScalarGridSpec(
            num_scalar_prefetch=0,
            grid=(grid_b,),
            in_specs=[x_spec] + param_specs,
            out_specs=pl.BlockSpec((tb, D), lambda i: (i, 0)),
        ),
        compiler_params=pltpu.CompilerParams(
            dimension_semantics=("parallel",),
            vmem_limit_bytes=32 * 1024 * 1024,
        ),
        cost_estimate=cost,
    )(x, *flat)


def fraud_autoencoder_ref(x, params):
    """Pure-JAX reference matching PyTorch semantics: y = x @ W.T + b."""
    hp = lax.Precision.HIGHEST
    (w1, b1), (w2, b2), (w3, b3), (w4, b4) = params
    h = jnp.maximum(jnp.dot(x, w1.T, precision=hp) + b1, 0.0)
    h = jnp.maximum(jnp.dot(h, w2.T, precision=hp) + b2, 0.0)
    h = jnp.maximum(jnp.dot(h, w3.T, precision=hp) + b3, 0.0)
    return jnp.dot(h, w4.T, precision=hp) + b4


if __name__ == "__main__":
    key = jax.random.PRNGKey(0)
    input_dim = 30  # credit-card-fraud style feature count
    params = init_params(key, input_dim)

    # 1) Small batch: single full-array block, f32.
    key, kx = jax.random.split(key)
    x_small = jax.random.normal(kx, (8, input_dim), dtype=jnp.float32)
    out_small = jax.block_until_ready(fraud_autoencoder(x_small, params))
    ref_small = fraud_autoencoder_ref(x_small, params)
    assert out_small.shape == (8, input_dim)
    assert jnp.allclose(out_small, ref_small, atol=1e-3, rtol=1e-3), \
        "small-batch mismatch vs reference"

    # 2) Multi-step grid with a ragged last block, f32.
    key, kx = jax.random.split(key)
    x_mid = jax.random.normal(kx, (700, input_dim), dtype=jnp.float32)
    out_mid = jax.block_until_ready(fraud_autoencoder(x_mid, params, max_tb=256))
    ref_mid = fraud_autoencoder_ref(x_mid, params)
    assert out_mid.shape == (700, input_dim)
    assert jnp.allclose(out_mid, ref_mid, atol=1e-3, rtol=1e-3), \
        "multi-block mismatch vs reference"

    # 3) bf16 activation/weight I/O (f32 accumulation), in-kernel chunked tile.
    params_bf16 = [(w.astype(jnp.bfloat16), b) for (w, b) in params]
    key, kx = jax.random.split(key)
    x_big = jax.random.normal(kx, (2048, input_dim), dtype=jnp.float32)
    x_bf16 = x_big.astype(jnp.bfloat16)
    out_bf16 = jax.block_until_ready(fraud_autoencoder(x_bf16, params_bf16))
    ref_bf16 = fraud_autoencoder_ref(
        x_bf16.astype(jnp.float32),
        [(w.astype(jnp.float32), b) for (w, b) in params_bf16])
    assert out_bf16.shape == (2048, input_dim)
    assert out_bf16.dtype == jnp.bfloat16
    assert jnp.allclose(out_bf16.astype(jnp.float32), ref_bf16,
                        atol=2e-2, rtol=2e-2), "bf16 mismatch vs reference"

    print("KERNEL_OK")
</pallas_src>

<mosaic_0001>
module attributes {stable_mosaic.version = 11 : i64} {
  func.func @_autoencoder_kernel(%arg0: i32, %arg1: memref<8x30xf32, #tpu.memory_space<vmem>>, %arg2: memref<32x30xf32, #tpu.memory_space<vmem>>, %arg3: memref<32x1xf32, #tpu.memory_space<vmem>>, %arg4: memref<16x32xf32, #tpu.memory_space<vmem>>, %arg5: memref<16x1xf32, #tpu.memory_space<vmem>>, %arg6: memref<32x16xf32, #tpu.memory_space<vmem>>, %arg7: memref<32x1xf32, #tpu.memory_space<vmem>>, %arg8: memref<30x32xf32, #tpu.memory_space<vmem>>, %arg9: memref<30x1xf32, #tpu.memory_space<vmem>>, %arg10: memref<8x30xf32, #tpu.memory_space<vmem>>) attributes {dimension_semantics = [#tpu.dimension_semantics<parallel>], iteration_bounds = array<i64: 1>, scalar_prefetch = 0 : i64, scratch_operands = 0 : i64, tpu.core_type = #tpu.core_type<tc>, window_params = [{transform_indices = @transform_0, window_bounds = array<i64: 8, 30>}, {pipeline_mode = #tpu.pipeline_mode<synchronous>, transform_indices = @transform_1, window_bounds = array<i64: 32, 30>}, {pipeline_mode = #tpu.pipeline_mode<synchronous>, transform_indices = @transform_2, window_bounds = array<i64: 32, 1>}, {pipeline_mode = #tpu.pipeline_mode<synchronous>, transform_indices = @transform_3, window_bounds = array<i64: 16, 32>}, {pipeline_mode = #tpu.pipeline_mode<synchronous>, transform_indices = @transform_4, window_bounds = array<i64: 16, 1>}, {pipeline_mode = #tpu.pipeline_mode<synchronous>, transform_indices = @transform_5, window_bounds = array<i64: 32, 16>}, {pipeline_mode = #tpu.pipeline_mode<synchronous>, transform_indices = @transform_6, window_bounds = array<i64: 32, 1>}, {pipeline_mode = #tpu.pipeline_mode<synchronous>, transform_indices = @transform_7, window_bounds = array<i64: 30, 32>}, {pipeline_mode = #tpu.pipeline_mode<synchronous>, transform_indices = @transform_8, window_bounds = array<i64: 30, 1>}, {transform_indices = @transform_9, window_bounds = array<i64: 8, 30>}]} {
    %c0 = arith.constant 0 : index
    %c0_0 = arith.constant 0 : index
    %0 = vector.load %arg2[%c0, %c0_0] : memref<32x30xf32, #tpu.memory_space<vmem>>, vector<32x30xf32>
    %c0_1 = arith.constant 0 : index
    %c0_2 = arith.constant 0 : index
    %1 = vector.load %arg3[%c0_1, %c0_2] : memref<32x1xf32, #tpu.memory_space<vmem>>, vector<32x1xf32>
    %c0_3 = arith.constant 0 : index
    %c0_4 = arith.constant 0 : index
    %2 = vector.load %arg4[%c0_3, %c0_4] : memref<16x32xf32, #tpu.memory_space<vmem>>, vector<16x32xf32>
    %c0_5 = arith.constant 0 : index
    %c0_6 = arith.constant 0 : index
    %3 = vector.load %arg5[%c0_5, %c0_6] : memref<16x1xf32, #tpu.memory_space<vmem>>, vector<16x1xf32>
    %c0_7 = arith.constant 0 : index
    %c0_8 = arith.constant 0 : index
    %4 = vector.load %arg6[%c0_7, %c0_8] : memref<32x16xf32, #tpu.memory_space<vmem>>, vector<32x16xf32>
    %c0_9 = arith.constant 0 : index
    %c0_10 = arith.constant 0 : index
    %5 = vector.load %arg7[%c0_9, %c0_10] : memref<32x1xf32, #tpu.memory_space<vmem>>, vector<32x1xf32>
    %c0_11 = arith.constant 0 : index
    %c0_12 = arith.constant 0 : index
    %6 = vector.load %arg8[%c0_11, %c0_12] : memref<30x32xf32, #tpu.memory_space<vmem>>, vector<30x32xf32>
    %c0_13 = arith.constant 0 : index
    %c0_14 = arith.constant 0 : index
    %7 = vector.load %arg9[%c0_13, %c0_14] : memref<30x1xf32, #tpu.memory_space<vmem>>, vector<30x1xf32>
    %c0_15 = arith.constant 0 : index
    %c0_16 = arith.constant 0 : index
    %8 = vector.load %arg1[%c0_15, %c0_16] : memref<8x30xf32, #tpu.memory_space<vmem>>, vector<8x30xf32>
    %9 = tpu.transpose %8, [1, 0] : vector<8x30xf32> -> vector<30x8xf32>
    %cst = arith.constant dense<0.000000e+00> : vector<32x8xf32>
    %10 = tpu.matmul %0, %9, %cst {dimension_numbers = #tpu.dot_dimension_numbers<[1], [0], [0], [1], [0, 0, 1, 1], [], []>} : vector<32x30xf32>, vector<30x8xf32>, vector<32x8xf32> -> vector<32x8xf32>
    %11 = vector.broadcast %1 : vector<32x1xf32> to vector<32x8xf32>
    %12 = arith.addf %10, %11 : vector<32x8xf32>
    %cst_17 = arith.constant 0.000000e+00 : f32
    %13 = vector.broadcast %cst_17 : f32 to vector<32x8xf32>
    %14 = arith.maximumf %12, %13 : vector<32x8xf32>
    %cst_18 = arith.constant dense<0.000000e+00> : vector<16x8xf32>
    %15 = tpu.matmul %2, %14, %cst_18 {dimension_numbers = #tpu.dot_dimension_numbers<[1], [0], [0], [1], [0, 0, 1, 1], [], []>} : vector<16x32xf32>, vector<32x8xf32>, vector<16x8xf32> -> vector<16x8xf32>
    %16 = vector.broadcast %3 : vector<16x1xf32> to vector<16x8xf32>
    %17 = arith.addf %15, %16 : vector<16x8xf32>
    %cst_19 = arith.constant 0.000000e+00 : f32
    %18 = vector.broadcast %cst_19 : f32 to vector<16x8xf32>
    %19 = arith.maximumf %17, %18 : vector<16x8xf32>
    %cst_20 = arith.constant dense<0.000000e+00> : vector<32x8xf32>
    %20 = tpu.matmul %4, %19, %cst_20 {dimension_numbers = #tpu.dot_dimension_numbers<[1], [0], [0], [1], [0, 0, 1, 1], [], []>} : vector<32x16xf32>, vector<16x8xf32>, vector<32x8xf32> -> vector<32x8xf32>
    %21 = vector.broadcast %5 : vector<32x1xf32> to vector<32x8xf32>
    %22 = arith.addf %20, %21 : vector<32x8xf32>
    %cst_21 = arith.constant 0.000000e+00 : f32
    %23 = vector.broadcast %cst_21 : f32 to vector<32x8xf32>
    %24 = arith.maximumf %22, %23 : vector<32x8xf32>
    %cst_22 = arith.constant dense<0.000000e+00> : vector<30x8xf32>
    %25 = tpu.matmul %6, %24, %cst_22 {dimension_numbers = #tpu.dot_dimension_numbers<[1], [0], [0], [1], [0, 0, 1, 1], [], []>} : vector<30x32xf32>, vector<32x8xf32>, vector<30x8xf32> -> vector<30x8xf32>
    %26 = vector.broadcast %7 : vector<30x1xf32> to vector<30x8xf32>
    %27 = arith.addf %25, %26 : vector<30x8xf32>
    %28 = tpu.transpose %27, [1, 0] : vector<30x8xf32> -> vector<8x30xf32>
    %c0_23 = arith.constant 0 : index
    %c0_24 = arith.constant 0 : index
    %29 = vector.load %arg10[%c0_23, %c0_24] : memref<8x30xf32, #tpu.memory_space<vmem>>, vector<8x30xf32>
    tpu.vector_store %arg10[%c0_23, %c0_24], %28 {strides = array<i32>} : memref<8x30xf32, #tpu.memory_space<vmem>>, vector<8x30xf32>,
    return
  }
  func.func @transform_0(%arg0: i32) -> (i32, i32) {
    %c0_i32 = arith.constant 0 : i32
    %c0_i32_0 = arith.constant 0 : i32
    return %arg0, %c0_i32 : i32, i32
  }
  func.func @transform_1(%arg0: i32) -> (i32, i32) {
    %c0_i32 = arith.constant 0 : i32
    %c0_i32_0 = arith.constant 0 : i32
    %c0_i32_1 = arith.constant 0 : i32
    return %c0_i32, %c0_i32_0 : i32, i32
  }
  func.func @transform_2(%arg0: i32) -> (i32, i32) {
    %c0_i32 = arith.constant 0 : i32
    %c0_i32_0 = arith.constant 0 : i32
    %c0_i32_1 = arith.constant 0 : i32
    return %c0_i32, %c0_i32_0 : i32, i32
  }
  func.func @transform_3(%arg0: i32) -> (i32, i32) {
    %c0_i32 = arith.constant 0 : i32
    %c0_i32_0 = arith.constant 0 : i32
    %c0_i32_1 = arith.constant 0 : i32
    return %c0_i32, %c0_i32_0 : i32, i32
  }
  func.func @transform_4(%arg0: i32) -> (i32, i32) {
    %c0_i32 = arith.constant 0 : i32
    %c0_i32_0 = arith.constant 0 : i32
    %c0_i32_1 = arith.constant 0 : i32
    return %c0_i32, %c0_i32_0 : i32, i32
  }
  func.func @transform_5(%arg0: i32) -> (i32, i32) {
    %c0_i32 = arith.constant 0 : i32
    %c0_i32_0 = arith.constant 0 : i32
    %c0_i32_1 = arith.constant 0 : i32
    return %c0_i32, %c0_i32_0 : i32, i32
  }
  func.func @transform_6(%arg0: i32) -> (i32, i32) {
    %c0_i32 = arith.constant 0 : i32
    %c0_i32_0 = arith.constant 0 : i32
    %c0_i32_1 = arith.constant 0 : i32
    return %c0_i32, %c0_i32_0 : i32, i32
  }
  func.func @transform_7(%arg0: i32) -> (i32, i32) {
    %c0_i32 = arith.constant 0 : i32
    %c0_i32_0 = arith.constant 0 : i32
    %c0_i32_1 = arith.constant 0 : i32
    return %c0_i32, %c0_i32_0 : i32, i32
  }
  func.func @transform_8(%arg0: i32) -> (i32, i32) {
    %c0_i32 = arith.constant 0 : i32
    %c0_i32_0 = arith.constant 0 : i32
    %c0_i32_1 = arith.constant 0 : i32
    return %c0_i32, %c0_i32_0 : i32, i32
  }
  func.func @transform_9(%arg0: i32) -> (i32, i32) {
    %c0_i32 = arith.constant 0 : i32
    %c0_i32_0 = arith.constant 0 : i32
    return %arg0, %c0_i32 : i32, i32
  }
}

</mosaic_0001>

<bundles_post_ra>
// kernel: fraud_autoencoder.1
= control target key start
LH: loop header
LB: loop body
LE: loop exit
PB: predicated region body
PF: predicated region fallthrough
CT: control target
= control target key end

     0   :  { %vm82_vm0 = vcmask 244736   ;;  %v677_v4 = vmov 0   ;;  %s836_s0 = inlined_call_operand.vmem [shape: f32[8,30], index: 0, kind: input, shape index: {}]   ;;  %s837_s1 = inlined_call_operand.vmem [shape: f32[32,30], index: 1, kind: input, shape index: {}]   ;;  %s838_s2 = inlined_call_operand.vmem [shape: f32[32,1], index: 2, kind: input, shape index: {}]   ;;  %s839_s3 = inlined_call_operand.vmem [shape: f32[16,32], index: 3, kind: input, shape index: {}]   ;;  %s840_s4 = inlined_call_operand.vmem [shape: f32[16,1], index: 4, kind: input, shape index: {}]   ;;  %s841_s5 = inlined_call_operand.vmem [shape: f32[32,16], index: 5, kind: input, shape index: {}]   ;;  %s842_s6 = inlined_call_operand.vmem [shape: f32[32,1], index: 6, kind: input, shape index: {}]   ;;  %s843_s7 = inlined_call_operand.vmem [shape: f32[30,32], index: 7, kind: input, shape index: {}]   ;;  %s844_s8 = inlined_call_operand.vmem [shape: f32[30,1], index: 8, kind: input, shape index: {}]   ;;  %s845_s9 = inlined_call_operand.hbm [shape: f32[8,30], index: 9, kind: output, shape index: {}]  }
   0x1   :  { %v61_v0 = vld [vmem:[%s836_s0] sm:$0xff]  ;;  %v40_v2 = vld [vmem:[%s838_s2 + $0x18] sm:$0xff]  ;;  %v34_v3 = vld [vmem:[%s837_s1 + $0x8] sm:$0xff]  ;;  %653 = vset.pattern.permute.xlu0 %v677_v4  ;;  %654 = vset.pattern.permute.xlu1 %v677_v4 }
   0x2   :  { %v33_v1 = vld [vmem:[%s837_s1] sm:$0xff]  ;;  %607 = vmatprep.subr.msk.mxu0 %vm82_vm0, %v61_v0  ;;  %v38_v5 = vld [vmem:[%s838_s2 + $0x8] sm:$0xff]  ;;  %v35_v6 = vld [vmem:[%s837_s1 + $0x10] sm:$0xff]  ;;  %79 = vperm.xlu0 %653, %v40_v2  }
   0x3   :  { %609 = vmatprep.mubr.msk.f32.mxu0 %vm82_vm0, %v33_v1  ;;  %608 = vmatpush3.xpose.msk.msra.mxu0 %vm82_vm0, %v61_v0  ;;  %v39_v7 = vld [vmem:[%s838_s2 + $0x10] sm:$0xff]  ;;  %v37_v8 = vld [vmem:[%s838_s2] sm:$0xff]  ;;  %v36_v9 = vld [vmem:[%s837_s1 + $0x18] sm:$0xff] }
   0x4   :  { %69 = vperm.xlu1 %654, %v38_v5  }
   0x6   :  { %610 = vmatmul.mubr.msk.f32.vlgmr.msra.gmra.mxu0 %vm82_vm0, %v34_v3 }
   0x7   :  { %612 = vmatprep.mubr.msk.f32.mxu0 %vm82_vm0, %v35_v6 }
   0x8   :  { %14 = vsyncpa [#allocation3], 0  ;;  %74 = vperm.xlu0 %653, %v39_v7   ;;  %v44_v10 = vld [vmem:[%s840_s4 + $0x8] sm:$0xff]  ;;  %64 = vperm.xlu1 %654, %v37_v8   ;;  %v43_v11 = vld [vmem:[%s840_s4] sm:$0xff]  ;;  %vm197_vm1 = vcmask 261120   ;;  %vm301_vm2 = vcmask 130048  }
   0x9   :  { %v52_v12 = vld [vmem:[%s842_s6 + $0x18] sm:$0xff]  ;;  %v51_v13 = vld [vmem:[%s842_s6 + $0x10] sm:$0xff]  ;;  %v50_v14 = vld [vmem:[%s842_s6 + $0x8] sm:$0xff]  ;;  %s678_s14 = smov [#allocation2]  }
   0xa   :  { %613 = vmatmul.mubr.msk.f32.gmra.mxu0 %vm82_vm0, %v36_v9  ;;  %v49_v15 = vld [vmem:[%s842_s6] sm:$0xff]  ;;  %v58_v17 = vld [vmem:[%s844_s8 + $0x8] sm:$0xff]  ;;  %v59_v18 = vld [vmem:[%s844_s8 + $0x10] sm:$0xff] }
   0xb   :  { %v57_v16 = vld [vmem:[%s844_s8] sm:$0xff]  ;;  %v60_v19 = vld [vmem:[%s844_s8 + $0x18] sm:$0x3f]  ;;  %v42_v37 = vld [vmem:[%s839_s3 + $0x8] sm:$0xff] }
   0xc   :  { %194 = vperm.xlu0 %653, %v44_v10   ;;  %189 = vperm.xlu1 %654, %v43_v11   ;;  %v41_v20 = vld [vmem:[%s839_s3] sm:$0xff]  ;;  %v46_v47 = vld [vmem:[%s841_s5 + $0x8] sm:$0xff]  ;;  %v47_v48 = vld [vmem:[%s841_s5 + $0x10] sm:$0xff] }
   0xd   :  { %623 = vmatprep.mubr.msk.f32.mxu1 %vm197_vm1, %v41_v20  ;;  %v45_v38 = vld [vmem:[%s841_s5] sm:$0xff]  ;;  %v48_v49 = vld [vmem:[%s841_s5 + $0x18] sm:$0xff]  ;;  %v54_v3 = vld [vmem:[%s843_s7 + $0x8] sm:$0xff] }
   0xe   :  { %630 = vmatprep.mubr.msk.f32.mxu0 %vm301_vm2, %v45_v38  ;;  %v53_v50 = vld [vmem:[%s843_s7] sm:$0xff]  ;;  %v55_v4 = vld [vmem:[%s843_s7 + $0x10] sm:$0xff]  ;;  %v56_v5 = vld [vmem:[%s843_s7 + $0x18] sm:$0x3f]  ;;  %s559_s7 = sshll.u32 %s678_s14, 4  ;;  %s560_s7 = int_to_ptr.vmem [resolvable:$true] %s559_s7 }
   0xf   :  { %s655_s4 = scalar_lea.vmem %s560_s7, 128  ;;  %p660_p1 = scmp.lt.s32.totalorder %s560_s7, %s560_s7 }
  0x10   :  { %298 = vperm.xlu0 %653, %v52_v12   ;;  %293 = vperm.xlu1 %654, %v51_v13   ;;  %p656_p0 = scmp.ne.s32.totalorder %s560_s7, %s655_s4  ;;  %p661_p2 = scmp.lt.s32.totalorder %s655_s4, %s655_s4 }
  0x12   :  { %p662_p3 = por %p661_p2, %p660_p1 }
  0x14   :  { %288 = vperm.xlu0 %653, %v50_v14   ;;  %283 = vperm.xlu1 %654, %v49_v15   ;;  %p663_p4 = pnand %p662_p3, %p656_p0 }
  0x18   :  { %405 = vperm.xlu0 %653, %v57_v16   ;;  %410 = vperm.xlu1 %654, %v58_v17  }
  0x1c   :  { %415 = vperm.xlu0 %653, %v59_v18   ;;  %420 = vperm.xlu1 %654, %v60_v19  }
  0x7d   :  { %v80_v21 = vpop.permute.xlu0 %79 }
  0x7f   :  { %v70_v23 = vpop.permute.xlu1 %69 }
  0x83   :  { %v75_v27 = vpop.permute.xlu0 %74  ;;  %v65_v32 = vpop.permute.xlu1 %64 }
  0x87   :  { %v195_v39 = vpop.permute.xlu0 %194  ;;  %v190_v42 = vpop.permute.xlu1 %189 }
  0x8b   :  { %v299_v51 = vpop.permute.xlu0 %298  ;;  %v294_v53 = vpop.permute.xlu1 %293 }
  0x8f   :  { %v289_v57 = vpop.permute.xlu0 %288  ;;  %v284_v62 = vpop.permute.xlu1 %283 }
  0x93   :  { %v406_v7 = vpop.permute.xlu0 %405  ;;  %v411_v11 = vpop.permute.xlu1 %410 }
  0x97   :  { %v416_v14 = vpop.permute.xlu0 %415  ;;  %v421_v16 = vpop.permute.xlu1 %420 }
  0xc6   :  { %v611_v22 = vpop.f32.mrf.mxu0 }
  0xc7   :  { %v170_v29 = vadd.f32 %v611_v22, %v70_v23 }
  0xc8   :  { %v164_v24 = vpop.f32.mrf.mxu0 }
  0xc9   :  { %v165_v33 = vadd.f32 %v164_v24, %v65_v32  ;;  %v184_v35 = vmax.f32 %v170_v29, 0.0 }
  0xca   :  { %v614_v25 = vpop.f32.mrf.mxu0 }
  0xcb   :  { %v180_v26 = vadd.f32 %v614_v25, %v80_v21  ;;  %v183_v36 = vmax.f32 %v165_v33, 0.0 }
  0xcc   :  { %v174_v28 = vpop.f32.mrf.mxu0 }
  0xcd   :  { %v186_v30 = vmax.f32 %v180_v26, 0.0  ;;  %v175_v31 = vadd.f32 %v174_v28, %v75_v27 }
  0xcf   :  { %v185_v34 = vmax.f32 %v175_v31, 0.0  ;;  %615 = vmatprep.subr.mxu1 %v186_v30 }
  0xd0   :  { %616 = vmatpush3.msra.mxu1 %v186_v30 }
  0xd1   :  { %617 = vmatprep.subr.mxu1 %v185_v34 }
  0xd2   :  { %618 = vmatpush3.msra.mxu1 %v185_v34 }
  0xd3   :  { %619 = vmatprep.subr.mxu1 %v184_v35 }
  0xd4   :  { %620 = vmatpush3.msra.mxu1 %v184_v35 }
  0xd5   :  { %621 = vmatprep.subr.mxu1 %v183_v36 }
  0xd6   :  { %622 = vmatpush3.msra.mxu1 %v183_v36 }
  0xd7   :  { %624 = vmatmul.mubr.msk.f32.vlgmr.msra.gmra.mxu1 %vm197_vm1, %v42_v37 }
  0xd8   :  { %644 = vmatprep.mubr.msk.f32.mxu1 %vm197_vm1, %v53_v50 }
 0x197   :  { %v625_v40 = vpop.f32.mrf.mxu1 }
 0x198   :  { %v276_v41 = vadd.f32 %v625_v40, %v195_v39 }
 0x199   :  { %v270_v43 = vpop.f32.mrf.mxu1 }
 0x19a   :  { %v280_v44 = vmax.f32 %v276_v41, 0.0  ;;  %v271_v45 = vadd.f32 %v270_v43, %v190_v42 }
 0x19c   :  { %v279_v46 = vmax.f32 %v271_v45, 0.0  ;;  %626 = vmatprep.subr.mxu0 %v280_v44 }
 0x19d   :  { %627 = vmatpush3.msra.mxu0 %v280_v44 }
 0x19e   :  { %628 = vmatprep.subr.mxu0 %v279_v46 }
 0x19f   :  { %629 = vmatpush3.msra.mxu0 %v279_v46 }
 0x1a0   :  { %631 = vmatmul.mubr.msk.f32.vlgmr.msra.gmra.mxu0 %vm301_vm2, %v46_v47 }
 0x1a1   :  { %633 = vmatprep.mubr.msk.f32.mxu0 %vm301_vm2, %v47_v48 }
 0x1a4   :  { %634 = vmatmul.mubr.msk.f32.gmra.mxu0 %vm301_vm2, %v48_v49 }
 0x260   :  { %v632_v52 = vpop.f32.mrf.mxu0 }
 0x261   :  { %v386_v59 = vadd.f32 %v632_v52, %v289_v57 }
 0x262   :  { %v380_v54 = vpop.f32.mrf.mxu0 }
 0x263   :  { %v381_v63 = vadd.f32 %v380_v54, %v284_v62  ;;  %v400_v1 = vmax.f32 %v386_v59, 0.0 }
 0x264   :  { %v635_v55 = vpop.f32.mrf.mxu0 }
 0x265   :  { %v396_v56 = vadd.f32 %v635_v55, %v299_v51  ;;  %v399_v2 = vmax.f32 %v381_v63, 0.0 }
 0x266   :  { %v390_v58 = vpop.f32.mrf.mxu0 }
 0x267   :  { %v402_v60 = vmax.f32 %v396_v56, 0.0  ;;  %v391_v61 = vadd.f32 %v390_v58, %v294_v53 }
 0x269   :  { %v401_v0 = vmax.f32 %v391_v61, 0.0  ;;  %636 = vmatprep.subr.mxu1 %v402_v60 }
 0x26a   :  { %637 = vmatpush3.msra.mxu1 %v402_v60 }
 0x26b   :  { %638 = vmatprep.subr.mxu1 %v401_v0 }
 0x26c   :  { %639 = vmatpush3.msra.mxu1 %v401_v0 }
 0x26d   :  { %640 = vmatprep.subr.mxu1 %v400_v1 }
 0x26e   :  { %641 = vmatpush3.msra.mxu1 %v400_v1 }
 0x26f   :  { %642 = vmatprep.subr.mxu1 %v399_v2 }
 0x270   :  { %643 = vmatpush3.msra.mxu1 %v399_v2 }
 0x271   :  { %645 = vmatmul.mubr.msk.f32.vlgmr.msra.gmra.mxu1 %vm197_vm1, %v54_v3 }
 0x272   :  { %647 = vmatprep.mubr.msk.f32.mxu1 %vm197_vm1, %v55_v4 }
 0x275   :  { %648 = vmatmul.mubr.msk.f32.gmra.mxu1 %vm197_vm1, %v56_v5 }
 0x331   :  { %v646_v6 = vpop.f32.mrf.mxu1 }
 0x332   :  { %v507_v12 = vadd.f32 %v646_v6, %v411_v11 }
 0x333   :  { %v501_v8 = vpop.f32.mrf.mxu1 }
 0x334   :  { %v502_v9 = vadd.f32 %v501_v8, %v406_v7 }
 0x335   :  { %v649_v10 = vpop.f32.mrf.mxu1 }
 0x336   :  { %520 = vxpose.xlu0.b32.start [1/4] (short) (narrow) %v502_v9, 8  ;;  %v517_v17 = vadd.f32 %v649_v10, %v421_v16 }
 0x337   :  { %v511_v13 = vpop.f32.mrf.mxu1 }
 0x338   :  { %v512_v15 = vadd.f32 %v511_v13, %v416_v14 }
 0x33a   :  { %521 = vxpose.xlu0.b32.cont [2/4] (short) (narrow) %v507_v12, 8 }
 0x33e   :  { %522 = vxpose.xlu0.b32.cont [3/4] (short) (narrow) %v512_v15, 8 }
 0x342   :  { %523 = vxpose.xlu0.b32.end [4/4] (short) (narrow) %v517_v17, 8 }
 0x3b2   :  { %v536_v18 = vpop.trf.xlu0 }
 0x3b3   :  { %552 = vst.msk [vmem:[#allocation2] sm:$0xff] %vm82_vm0, %v536_v18 }
 0x3b4   :  { %666 = shalt.err (!%p663_p4)
}
 0x3b5   :  { %562 = dma.vmem_to_hbm [thread:$0]  %s560_s7, 128, %s845_s9, [#allocation3]  }
 0x3b6   :  { %675 = dma.done.wait [#allocation3], 128  }
 0x3b7   :  { %676 = vsyncadd [#allocation3], 4294967168 }
 0x3b8   :  { %566 = vsyncpa [#allocation3], 1 }

</bundles_post_ra>
